<compile_context>
chip_gen: v7x
topology: tpu7x:2x2x1
jax: 0.10.0
libtpu: 0.0.40
codegen_flags: <defaults>
</compile_context>

<pallas_src>
import math
import functools

import jax
import jax.numpy as jnp
from jax import lax
from jax.experimental import pallas as pl
from jax.experimental.pallas import tpu as pltpu


def mha_kernel(q_ref, k_ref, v_ref,
               wq_ref, bq_ref, wk_ref, bk_ref,
               wv_ref, bv_ref, wo_ref, bo_ref,
               out_ref, *, num_heads, d_k):
    # Each grid step handles one batch element: q/k/v refs are (1, S, D) views.
    xq = q_ref[0]          # (S, D) bf16
    xk = k_ref[0]
    xv = v_ref[0]

    # Pre-transposed weights ([in, out]); 1/sqrt(d_k) already folded into wq/bq.
    wq = wq_ref[...]       # (D, D) bf16
    wk = wk_ref[...]
    wv = wv_ref[...]
    wo = wo_ref[...]
    bq = bq_ref[...]       # (1, D) f32
    bk = bk_ref[...]
    bv = bv_ref[...]
    bo = bo_ref[...]

    f32 = jnp.float32
    bf16 = jnp.bfloat16

    # Projections: bf16 MXU matmuls, f32 accumulate, bias add in f32.
    Q = (jnp.dot(xq, wq, preferred_element_type=f32) + bq).astype(bf16)   # (S, D)
    K = (jnp.dot(xk, wk, preferred_element_type=f32) + bk).astype(bf16)
    V = (jnp.dot(xv, wv, preferred_element_type=f32) + bv).astype(bf16)

    S, D = Q.shape[0], Q.shape[1]

    # Fused "concat + output projection" accumulator, seeded with the bias.
    acc = jnp.broadcast_to(bo, (S, D)).astype(f32)

    # NOTE: d_k < 128 keeps these per-head tiles sub-lane-width; for real model
    # sizes a lane-dense head batching / d_k padding would be preferable.
    for h in range(num_heads):
        lo = h * d_k
        Qh = Q[:, lo:lo + d_k]                         # (S, d_k)
        Kh = K[:, lo:lo + d_k]
        Vh = V[:, lo:lo + d_k]

        # Q.K^T without a physical K transpose: contract both last dims.
        scores = lax.dot_general(
            Qh, Kh, (((1,), (1,)), ((), ())),
            preferred_element_type=f32)                # (S, S) f32, pre-scaled

        # Numerically stable softmax (f32); divide only the (S,1) row sums.
        m = jnp.max(scores, axis=-1, keepdims=True)
        e = jnp.exp(scores - m)
        denom = jnp.sum(e, axis=-1, keepdims=True)
        attn = (e * pl.reciprocal(denom, approx=True)).astype(bf16)   # (S, S)

        head_out = jnp.dot(attn, Vh, preferred_element_type=f32)      # (S, d_k)

        # Accumulate this head's contribution to the output projection:
        # equivalent to concatenating heads and doing one (S,D)x(D,D) matmul.
        acc = acc + jnp.dot(head_out.astype(bf16), wo[lo:lo + d_k, :],
                            preferred_element_type=f32)

    out_ref[0] = acc.astype(out_ref.dtype)


def multi_head_attention(query, key, value, params, *, num_heads):
    """query/key/value: [B, S, d_model] float32.  params: PyTorch-style weights."""
    B, S, D = query.shape
    assert D % num_heads == 0
    d_k = D // num_heads
    inv_sqrt_dk = 1.0 / math.sqrt(d_k)

    bf16 = jnp.bfloat16
    f32 = jnp.float32

    # Pre-transpose to [in, out], fold the attention scale into the Q
    # projection, and cast matmul operands to bf16 (halves DMA / VMEM bytes).
    wq_t = (params["wq"].T * inv_sqrt_dk).astype(bf16)
    wk_t = params["wk"].T.astype(bf16)
    wv_t = params["wv"].T.astype(bf16)
    wo_t = params["wo"].T.astype(bf16)
    bq = (params["bq"] * inv_sqrt_dk).reshape(1, D).astype(f32)
    bk = params["bk"].reshape(1, D).astype(f32)
    bv = params["bv"].reshape(1, D).astype(f32)
    bo = params["bo"].reshape(1, D).astype(f32)

    q = query.astype(bf16)
    k = key.astype(bf16)
    v = value.astype(bf16)

    seq_spec = pl.BlockSpec((1, S, D), lambda b: (b, 0, 0))
    w_spec = pl.BlockSpec((D, D), lambda b: (0, 0))    # grid-invariant
    b_spec = pl.BlockSpec((1, D), lambda b: (0, 0))    # grid-invariant

    kernel = functools.partial(mha_kernel, num_heads=num_heads, d_k=d_k)

    return pl.pallas_call(
        kernel,
        out_shape=jax.ShapeDtypeStruct((B, S, D), query.dtype),
        grid_spec=pltpu.PrefetchScalarGridSpec(
            num_scalar_prefetch=0,
            grid=(B,),
            in_specs=[seq_spec, seq_spec, seq_spec,
                      w_spec, b_spec, w_spec, b_spec,
                      w_spec, b_spec, w_spec, b_spec],
            out_specs=seq_spec,
        ),
        compiler_params=pltpu.CompilerParams(
            dimension_semantics=("parallel",),
            vmem_limit_bytes=32 * 1024 * 1024),
    )(q, k, v, wq_t, bq, wk_t, bk, wv_t, bv, wo_t, bo)


def _reference(query, key, value, params, *, num_heads):
    """Plain-JAX f32 reference of the PyTorch forward, for validation."""
    B, S, D = query.shape
    d_k = D // num_heads

    def lin(x, w, b):
        return x @ w.T + b

    Q = lin(query, params["wq"], params["bq"])
    K = lin(key, params["wk"], params["bk"])
    V = lin(value, params["wv"], params["bv"])

    def split(x):  # (B, S, D) -> (B, H, S, d_k)
        return x.reshape(B, S, num_heads, d_k).transpose(0, 2, 1, 3)

    Qh, Kh, Vh = split(Q), split(K), split(V)
    scores = jnp.einsum("bhqd,bhkd->bhqk", Qh, Kh) / math.sqrt(d_k)
    attn = jax.nn.softmax(scores, axis=-1)
    out = jnp.einsum("bhqk,bhkd->bhqd", attn, Vh)
    out = out.transpose(0, 2, 1, 3).reshape(B, S, D)
    return lin(out, params["wo"], params["bo"])


if __name__ == "__main__":
    B, S, D, H = 2, 8, 32, 4   # batch, seq, d_model, num_heads

    key0 = jax.random.PRNGKey(0)
    ks = jax.random.split(key0, 12)
    bound = 1.0 / math.sqrt(D)   # PyTorch nn.Linear default init range

    def u(k, shape):
        return jax.random.uniform(k, shape, jnp.float32, -bound, bound)

    params = {
        "wq": u(ks[0], (D, D)), "bq": u(ks[1], (D,)),
        "wk": u(ks[2], (D, D)), "bk": u(ks[3], (D,)),
        "wv": u(ks[4], (D, D)), "bv": u(ks[5], (D,)),
        "wo": u(ks[6], (D, D)), "bo": u(ks[7], (D,)),
    }

    query = jax.random.normal(ks[8], (B, S, D), jnp.float32)
    key = jax.random.normal(ks[9], (B, S, D), jnp.float32)
    value = jax.random.normal(ks[10], (B, S, D), jnp.float32)

    out = multi_head_attention(query, key, value, params, num_heads=H)
    out = jax.block_until_ready(out)

    ref = _reference(query, key, value, params, num_heads=H)
    assert out.shape == (B, S, D)
    # Tolerance reflects bf16 MXU operands + approximate reciprocal vs f32 reference.
    max_err = float(jnp.max(jnp.abs(out - ref)))
    assert jnp.allclose(out, ref, atol=5e-2, rtol=5e-2), f"mismatch vs reference: {max_err}"

    print("KERNEL_OK")
</pallas_src>

<mosaic_0001>
module attributes {stable_mosaic.version = 11 : i64} {
  func.func @mha_kernel(%arg0: i32, %arg1: memref<1x8x32xbf16, #tpu.memory_space<vmem>>, %arg2: memref<1x8x32xbf16, #tpu.memory_space<vmem>>, %arg3: memref<1x8x32xbf16, #tpu.memory_space<vmem>>, %arg4: memref<32x32xbf16, #tpu.memory_space<vmem>>, %arg5: memref<1x32xf32, #tpu.memory_space<vmem>>, %arg6: memref<32x32xbf16, #tpu.memory_space<vmem>>, %arg7: memref<1x32xf32, #tpu.memory_space<vmem>>, %arg8: memref<32x32xbf16, #tpu.memory_space<vmem>>, %arg9: memref<1x32xf32, #tpu.memory_space<vmem>>, %arg10: memref<32x32xbf16, #tpu.memory_space<vmem>>, %arg11: memref<1x32xf32, #tpu.memory_space<vmem>>, %arg12: memref<1x8x32xf32, #tpu.memory_space<vmem>>) attributes {dimension_semantics = [#tpu.dimension_semantics<parallel>], iteration_bounds = array<i64: 2>, scalar_prefetch = 0 : i64, scratch_operands = 0 : i64, tpu.core_type = #tpu.core_type<tc>, window_params = [{transform_indices = @transform_0, window_bounds = array<i64: 1, 8, 32>}, {transform_indices = @transform_1, window_bounds = array<i64: 1, 8, 32>}, {transform_indices = @transform_2, window_bounds = array<i64: 1, 8, 32>}, {pipeline_mode = #tpu.pipeline_mode<synchronous>, transform_indices = @transform_3, window_bounds = array<i64: 32, 32>}, {pipeline_mode = #tpu.pipeline_mode<synchronous>, transform_indices = @transform_4, window_bounds = array<i64: 1, 32>}, {pipeline_mode = #tpu.pipeline_mode<synchronous>, transform_indices = @transform_5, window_bounds = array<i64: 32, 32>}, {pipeline_mode = #tpu.pipeline_mode<synchronous>, transform_indices = @transform_6, window_bounds = array<i64: 1, 32>}, {pipeline_mode = #tpu.pipeline_mode<synchronous>, transform_indices = @transform_7, window_bounds = array<i64: 32, 32>}, {pipeline_mode = #tpu.pipeline_mode<synchronous>, transform_indices = @transform_8, window_bounds = array<i64: 1, 32>}, {pipeline_mode = #tpu.pipeline_mode<synchronous>, transform_indices = @transform_9, window_bounds = array<i64: 32, 32>}, {pipeline_mode = #tpu.pipeline_mode<synchronous>, transform_indices = @transform_10, window_bounds = array<i64: 1, 32>}, {transform_indices = @transform_11, window_bounds = array<i64: 1, 8, 32>}]} {
    %c0 = arith.constant 0 : index
    %c0_0 = arith.constant 0 : index
    %c0_1 = arith.constant 0 : index
    %0 = vector.load %arg1[%c0, %c0_0, %c0_1] : memref<1x8x32xbf16, #tpu.memory_space<vmem>>, vector<1x8x32xbf16>
    %1 = vector.shape_cast %0 : vector<1x8x32xbf16> to vector<8x32xbf16>
    %c0_2 = arith.constant 0 : index
    %c0_3 = arith.constant 0 : index
    %c0_4 = arith.constant 0 : index
    %2 = vector.load %arg2[%c0_2, %c0_3, %c0_4] : memref<1x8x32xbf16, #tpu.memory_space<vmem>>, vector<1x8x32xbf16>
    %3 = vector.shape_cast %2 : vector<1x8x32xbf16> to vector<8x32xbf16>
    %c0_5 = arith.constant 0 : index
    %c0_6 = arith.constant 0 : index
    %c0_7 = arith.constant 0 : index
    %4 = vector.load %arg3[%c0_5, %c0_6, %c0_7] : memref<1x8x32xbf16, #tpu.memory_space<vmem>>, vector<1x8x32xbf16>
    %5 = vector.shape_cast %4 : vector<1x8x32xbf16> to vector<8x32xbf16>
    %c0_8 = arith.constant 0 : index
    %c0_9 = arith.constant 0 : index
    %6 = vector.load %arg4[%c0_8, %c0_9] : memref<32x32xbf16, #tpu.memory_space<vmem>>, vector<32x32xbf16>
    %c0_10 = arith.constant 0 : index
    %c0_11 = arith.constant 0 : index
    %7 = vector.load %arg6[%c0_10, %c0_11] : memref<32x32xbf16, #tpu.memory_space<vmem>>, vector<32x32xbf16>
    %c0_12 = arith.constant 0 : index
    %c0_13 = arith.constant 0 : index
    %8 = vector.load %arg8[%c0_12, %c0_13] : memref<32x32xbf16, #tpu.memory_space<vmem>>, vector<32x32xbf16>
    %c0_14 = arith.constant 0 : index
    %c0_15 = arith.constant 0 : index
    %9 = vector.load %arg10[%c0_14, %c0_15] : memref<32x32xbf16, #tpu.memory_space<vmem>>, vector<32x32xbf16>
    %c0_16 = arith.constant 0 : index
    %c0_17 = arith.constant 0 : index
    %10 = vector.load %arg5[%c0_16, %c0_17] : memref<1x32xf32, #tpu.memory_space<vmem>>, vector<1x32xf32>
    %c0_18 = arith.constant 0 : index
    %c0_19 = arith.constant 0 : index
    %11 = vector.load %arg7[%c0_18, %c0_19] : memref<1x32xf32, #tpu.memory_space<vmem>>, vector<1x32xf32>
    %c0_20 = arith.constant 0 : index
    %c0_21 = arith.constant 0 : index
    %12 = vector.load %arg9[%c0_20, %c0_21] : memref<1x32xf32, #tpu.memory_space<vmem>>, vector<1x32xf32>
    %c0_22 = arith.constant 0 : index
    %c0_23 = arith.constant 0 : index
    %13 = vector.load %arg11[%c0_22, %c0_23] : memref<1x32xf32, #tpu.memory_space<vmem>>, vector<1x32xf32>
    %cst = arith.constant dense<0.000000e+00> : vector<8x32xf32>
    %14 = tpu.matmul %1, %6, %cst {dimension_numbers = #tpu.dot_dimension_numbers<[1], [0], [0], [1], [0, 0, 1, 1], [], []>} : vector<8x32xbf16>, vector<32x32xbf16>, vector<8x32xf32> -> vector<8x32xf32>
    %15 = vector.broadcast %10 : vector<1x32xf32> to vector<8x32xf32>
    %16 = arith.addf %14, %15 : vector<8x32xf32>
    %17 = arith.truncf %16 : vector<8x32xf32> to vector<8x32xbf16>
    %cst_24 = arith.constant dense<0.000000e+00> : vector<8x32xf32>
    %18 = tpu.matmul %3, %7, %cst_24 {dimension_numbers = #tpu.dot_dimension_numbers<[1], [0], [0], [1], [0, 0, 1, 1], [], []>} : vector<8x32xbf16>, vector<32x32xbf16>, vector<8x32xf32> -> vector<8x32xf32>
    %19 = vector.broadcast %11 : vector<1x32xf32> to vector<8x32xf32>
    %20 = arith.addf %18, %19 : vector<8x32xf32>
    %21 = arith.truncf %20 : vector<8x32xf32> to vector<8x32xbf16>
    %cst_25 = arith.constant dense<0.000000e+00> : vector<8x32xf32>
    %22 = tpu.matmul %5, %8, %cst_25 {dimension_numbers = #tpu.dot_dimension_numbers<[1], [0], [0], [1], [0, 0, 1, 1], [], []>} : vector<8x32xbf16>, vector<32x32xbf16>, vector<8x32xf32> -> vector<8x32xf32>
    %23 = vector.broadcast %12 : vector<1x32xf32> to vector<8x32xf32>
    %24 = arith.addf %22, %23 : vector<8x32xf32>
    %25 = arith.truncf %24 : vector<8x32xf32> to vector<8x32xbf16>
    %26 = vector.shape_cast %13 : vector<1x32xf32> to vector<1x32xf32>
    %27 = vector.broadcast %26 : vector<1x32xf32> to vector<8x32xf32>
    %28 = vector.extract_strided_slice %17 {offsets = [0, 0], sizes = [8, 8], strides = [1, 1]} : vector<8x32xbf16> to vector<8x8xbf16>
    %29 = vector.extract_strided_slice %21 {offsets = [0, 0], sizes = [8, 8], strides = [1, 1]} : vector<8x32xbf16> to vector<8x8xbf16>
    %30 = vector.extract_strided_slice %25 {offsets = [0, 0], sizes = [8, 8], strides = [1, 1]} : vector<8x32xbf16> to vector<8x8xbf16>
    %cst_26 = arith.constant dense<0.000000e+00> : vector<8x8xf32>
    %31 = tpu.matmul %28, %29, %cst_26 {dimension_numbers = #tpu.dot_dimension_numbers<[1], [1], [0], [0], [0, 0, 1, 0], [], []>} : vector<8x8xbf16>, vector<8x8xbf16>, vector<8x8xf32> -> vector<8x8xf32>
    %cst_27 = arith.constant dense<0xFF800000> : vector<8xf32>
    %32 = vector.multi_reduction <maximumf>, %31, %cst_27 [1] : vector<8x8xf32> to vector<8xf32>
    %33 = vector.shape_cast %32 : vector<8xf32> to vector<8x1xf32>
    %34 = vector.broadcast %33 : vector<8x1xf32> to vector<8x8xf32>
    %35 = arith.subf %31, %34 : vector<8x8xf32>
    %36 = math.exp %35 : vector<8x8xf32>
    %cst_28 = arith.constant dense<0.000000e+00> : vector<8xf32>
    %37 = vector.multi_reduction <add>, %36, %cst_28 [1] : vector<8x8xf32> to vector<8xf32>
    %38 = vector.shape_cast %37 : vector<8xf32> to vector<8x1xf32>
    %39 = tpu.reciprocal %38 {approx = true} : vector<8x1xf32> -> vector<8x1xf32>
    %40 = vector.broadcast %39 : vector<8x1xf32> to vector<8x8xf32>
    %41 = arith.mulf %36, %40 : vector<8x8xf32>
    %42 = arith.truncf %41 : vector<8x8xf32> to vector<8x8xbf16>
    %cst_29 = arith.constant dense<0.000000e+00> : vector<8x8xf32>
    %43 = tpu.matmul %42, %30, %cst_29 {dimension_numbers = #tpu.dot_dimension_numbers<[1], [0], [0], [1], [0, 0, 1, 1], [], []>} : vector<8x8xbf16>, vector<8x8xbf16>, vector<8x8xf32> -> vector<8x8xf32>
    %44 = arith.truncf %43 : vector<8x8xf32> to vector<8x8xbf16>
    %45 = vector.extract_strided_slice %9 {offsets = [0, 0], sizes = [8, 32], strides = [1, 1]} : vector<32x32xbf16> to vector<8x32xbf16>
    %cst_30 = arith.constant dense<0.000000e+00> : vector<8x32xf32>
    %46 = tpu.matmul %44, %45, %cst_30 {dimension_numbers = #tpu.dot_dimension_numbers<[1], [0], [0], [1], [0, 0, 1, 1], [], []>} : vector<8x8xbf16>, vector<8x32xbf16>, vector<8x32xf32> -> vector<8x32xf32>
    %47 = arith.addf %27, %46 : vector<8x32xf32>
    %48 = vector.extract_strided_slice %17 {offsets = [0, 8], sizes = [8, 8], strides = [1, 1]} : vector<8x32xbf16> to vector<8x8xbf16>
    %49 = vector.extract_strided_slice %21 {offsets = [0, 8], sizes = [8, 8], strides = [1, 1]} : vector<8x32xbf16> to vector<8x8xbf16>
    %50 = vector.extract_strided_slice %25 {offsets = [0, 8], sizes = [8, 8], strides = [1, 1]} : vector<8x32xbf16> to vector<8x8xbf16>
    %cst_31 = arith.constant dense<0.000000e+00> : vector<8x8xf32>
    %51 = tpu.matmul %48, %49, %cst_31 {dimension_numbers = #tpu.dot_dimension_numbers<[1], [1], [0], [0], [0, 0, 1, 0], [], []>} : vector<8x8xbf16>, vector<8x8xbf16>, vector<8x8xf32> -> vector<8x8xf32>
    %cst_32 = arith.constant dense<0xFF800000> : vector<8xf32>
    %52 = vector.multi_reduction <maximumf>, %51, %cst_32 [1] : vector<8x8xf32> to vector<8xf32>
    %53 = vector.shape_cast %52 : vector<8xf32> to vector<8x1xf32>
    %54 = vector.broadcast %53 : vector<8x1xf32> to vector<8x8xf32>
    %55 = arith.subf %51, %54 : vector<8x8xf32>
    %56 = math.exp %55 : vector<8x8xf32>
    %cst_33 = arith.constant dense<0.000000e+00> : vector<8xf32>
    %57 = vector.multi_reduction <add>, %56, %cst_33 [1] : vector<8x8xf32> to vector<8xf32>
    %58 = vector.shape_cast %57 : vector<8xf32> to vector<8x1xf32>
    %59 = tpu.reciprocal %58 {approx = true} : vector<8x1xf32> -> vector<8x1xf32>
    %60 = vector.broadcast %59 : vector<8x1xf32> to vector<8x8xf32>
    %61 = arith.mulf %56, %60 : vector<8x8xf32>
    %62 = arith.truncf %61 : vector<8x8xf32> to vector<8x8xbf16>
    %cst_34 = arith.constant dense<0.000000e+00> : vector<8x8xf32>
    %63 = tpu.matmul %62, %50, %cst_34 {dimension_numbers = #tpu.dot_dimension_numbers<[1], [0], [0], [1], [0, 0, 1, 1], [], []>} : vector<8x8xbf16>, vector<8x8xbf16>, vector<8x8xf32> -> vector<8x8xf32>
    %64 = arith.truncf %63 : vector<8x8xf32> to vector<8x8xbf16>
    %65 = vector.extract_strided_slice %9 {offsets = [8, 0], sizes = [8, 32], strides = [1, 1]} : vector<32x32xbf16> to vector<8x32xbf16>
    %cst_35 = arith.constant dense<0.000000e+00> : vector<8x32xf32>
    %66 = tpu.matmul %64, %65, %cst_35 {dimension_numbers = #tpu.dot_dimension_numbers<[1], [0], [0], [1], [0, 0, 1, 1], [], []>} : vector<8x8xbf16>, vector<8x32xbf16>, vector<8x32xf32> -> vector<8x32xf32>
    %67 = arith.addf %47, %66 : vector<8x32xf32>
    %68 = vector.extract_strided_slice %17 {offsets = [0, 16], sizes = [8, 8], strides = [1, 1]} : vector<8x32xbf16> to vector<8x8xbf16>
    %69 = vector.extract_strided_slice %21 {offsets = [0, 16], sizes = [8, 8], strides = [1, 1]} : vector<8x32xbf16> to vector<8x8xbf16>
    %70 = vector.extract_strided_slice %25 {offsets = [0, 16], sizes = [8, 8], strides = [1, 1]} : vector<8x32xbf16> to vector<8x8xbf16>
    %cst_36 = arith.constant dense<0.000000e+00> : vector<8x8xf32>
    %71 = tpu.matmul %68, %69, %cst_36 {dimension_numbers = #tpu.dot_dimension_numbers<[1], [1], [0], [0], [0, 0, 1, 0], [], []>} : vector<8x8xbf16>, vector<8x8xbf16>, vector<8x8xf32> -> vector<8x8xf32>
    %cst_37 = arith.constant dense<0xFF800000> : vector<8xf32>
    %72 = vector.multi_reduction <maximumf>, %71, %cst_37 [1] : vector<8x8xf32> to vector<8xf32>
    %73 = vector.shape_cast %72 : vector<8xf32> to vector<8x1xf32>
    %74 = vector.broadcast %73 : vector<8x1xf32> to vector<8x8xf32>
    %75 = arith.subf %71, %74 : vector<8x8xf32>
    %76 = math.exp %75 : vector<8x8xf32>
    %cst_38 = arith.constant dense<0.000000e+00> : vector<8xf32>
    %77 = vector.multi_reduction <add>, %76, %cst_38 [1] : vector<8x8xf32> to vector<8xf32>
    %78 = vector.shape_cast %77 : vector<8xf32> to vector<8x1xf32>
    %79 = tpu.reciprocal %78 {approx = true} : vector<8x1xf32> -> vector<8x1xf32>
    %80 = vector.broadcast %79 : vector<8x1xf32> to vector<8x8xf32>
    %81 = arith.mulf %76, %80 : vector<8x8xf32>
    %82 = arith.truncf %81 : vector<8x8xf32> to vector<8x8xbf16>
    %cst_39 = arith.constant dense<0.000000e+00> : vector<8x8xf32>
    %83 = tpu.matmul %82, %70, %cst_39 {dimension_numbers = #tpu.dot_dimension_numbers<[1], [0], [0], [1], [0, 0, 1, 1], [], []>} : vector<8x8xbf16>, vector<8x8xbf16>, vector<8x8xf32> -> vector<8x8xf32>
    %84 = arith.truncf %83 : vector<8x8xf32> to vector<8x8xbf16>
    %85 = vector.extract_strided_slice %9 {offsets = [16, 0], sizes = [8, 32], strides = [1, 1]} : vector<32x32xbf16> to vector<8x32xbf16>
    %cst_40 = arith.constant dense<0.000000e+00> : vector<8x32xf32>
    %86 = tpu.matmul %84, %85, %cst_40 {dimension_numbers = #tpu.dot_dimension_numbers<[1], [0], [0], [1], [0, 0, 1, 1], [], []>} : vector<8x8xbf16>, vector<8x32xbf16>, vector<8x32xf32> -> vector<8x32xf32>
    %87 = arith.addf %67, %86 : vector<8x32xf32>
    %88 = vector.extract_strided_slice %17 {offsets = [0, 24], sizes = [8, 8], strides = [1, 1]} : vector<8x32xbf16> to vector<8x8xbf16>
    %89 = vector.extract_strided_slice %21 {offsets = [0, 24], sizes = [8, 8], strides = [1, 1]} : vector<8x32xbf16> to vector<8x8xbf16>
    %90 = vector.extract_strided_slice %25 {offsets = [0, 24], sizes = [8, 8], strides = [1, 1]} : vector<8x32xbf16> to vector<8x8xbf16>
    %cst_41 = arith.constant dense<0.000000e+00> : vector<8x8xf32>
    %91 = tpu.matmul %88, %89, %cst_41 {dimension_numbers = #tpu.dot_dimension_numbers<[1], [1], [0], [0], [0, 0, 1, 0], [], []>} : vector<8x8xbf16>, vector<8x8xbf16>, vector<8x8xf32> -> vector<8x8xf32>
    %cst_42 = arith.constant dense<0xFF800000> : vector<8xf32>
    %92 = vector.multi_reduction <maximumf>, %91, %cst_42 [1] : vector<8x8xf32> to vector<8xf32>
    %93 = vector.shape_cast %92 : vector<8xf32> to vector<8x1xf32>
    %94 = vector.broadcast %93 : vector<8x1xf32> to vector<8x8xf32>
    %95 = arith.subf %91, %94 : vector<8x8xf32>
    %96 = math.exp %95 : vector<8x8xf32>
    %cst_43 = arith.constant dense<0.000000e+00> : vector<8xf32>
    %97 = vector.multi_reduction <add>, %96, %cst_43 [1] : vector<8x8xf32> to vector<8xf32>
    %98 = vector.shape_cast %97 : vector<8xf32> to vector<8x1xf32>
    %99 = tpu.reciprocal %98 {approx = true} : vector<8x1xf32> -> vector<8x1xf32>
    %100 = vector.broadcast %99 : vector<8x1xf32> to vector<8x8xf32>
    %101 = arith.mulf %96, %100 : vector<8x8xf32>
    %102 = arith.truncf %101 : vector<8x8xf32> to vector<8x8xbf16>
    %cst_44 = arith.constant dense<0.000000e+00> : vector<8x8xf32>
    %103 = tpu.matmul %102, %90, %cst_44 {dimension_numbers = #tpu.dot_dimension_numbers<[1], [0], [0], [1], [0, 0, 1, 1], [], []>} : vector<8x8xbf16>, vector<8x8xbf16>, vector<8x8xf32> -> vector<8x8xf32>
    %104 = arith.truncf %103 : vector<8x8xf32> to vector<8x8xbf16>
    %105 = vector.extract_strided_slice %9 {offsets = [24, 0], sizes = [8, 32], strides = [1, 1]} : vector<32x32xbf16> to vector<8x32xbf16>
    %cst_45 = arith.constant dense<0.000000e+00> : vector<8x32xf32>
    %106 = tpu.matmul %104, %105, %cst_45 {dimension_numbers = #tpu.dot_dimension_numbers<[1], [0], [0], [1], [0, 0, 1, 1], [], []>} : vector<8x8xbf16>, vector<8x32xbf16>, vector<8x32xf32> -> vector<8x32xf32>
    %107 = arith.addf %87, %106 : vector<8x32xf32>
    %c0_46 = arith.constant 0 : index
    %c0_47 = arith.constant 0 : index
    %c0_48 = arith.constant 0 : index
    %108 = vector.load %arg12[%c0_46, %c0_47, %c0_48] : memref<1x8x32xf32, #tpu.memory_space<vmem>>, vector<1x8x32xf32>
    %109 = vector.shape_cast %108 : vector<1x8x32xf32> to vector<8x32xf32>
    %110 = vector.shape_cast %107 : vector<8x32xf32> to vector<1x8x32xf32>
    tpu.vector_store %arg12[%c0_46, %c0_47, %c0_48], %110 {strides = array<i32>} : memref<1x8x32xf32, #tpu.memory_space<vmem>>, vector<1x8x32xf32>,
    return
  }
  func.func @transform_0(%arg0: i32) -> (i32, i32, i32) {
    %c0_i32 = arith.constant 0 : i32
    %c0_i32_0 = arith.constant 0 : i32
    %c0_i32_1 = arith.constant 0 : i32
    return %arg0, %c0_i32, %c0_i32_0 : i32, i32, i32
  }
  func.func @transform_1(%arg0: i32) -> (i32, i32, i32) {
    %c0_i32 = arith.constant 0 : i32
    %c0_i32_0 = arith.constant 0 : i32
    %c0_i32_1 = arith.constant 0 : i32
    return %arg0, %c0_i32, %c0_i32_0 : i32, i32, i32
  }
  func.func @transform_2(%arg0: i32) -> (i32, i32, i32) {
    %c0_i32 = arith.constant 0 : i32
    %c0_i32_0 = arith.constant 0 : i32
    %c0_i32_1 = arith.constant 0 : i32
    return %arg0, %c0_i32, %c0_i32_0 : i32, i32, i32
  }
  func.func @transform_3(%arg0: i32) -> (i32, i32) {
    %c0_i32 = arith.constant 0 : i32
    %c0_i32_0 = arith.constant 0 : i32
    %c0_i32_1 = arith.constant 0 : i32
    return %c0_i32, %c0_i32_0 : i32, i32
  }
  func.func @transform_4(%arg0: i32) -> (i32, i32) {
    %c0_i32 = arith.constant 0 : i32
    %c0_i32_0 = arith.constant 0 : i32
    %c0_i32_1 = arith.constant 0 : i32
    return %c0_i32, %c0_i32_0 : i32, i32
  }
  func.func @transform_5(%arg0: i32) -> (i32, i32) {
    %c0_i32 = arith.constant 0 : i32
    %c0_i32_0 = arith.constant 0 : i32
    %c0_i32_1 = arith.constant 0 : i32
    return %c0_i32, %c0_i32_0 : i32, i32
  }
  func.func @transform_6(%arg0: i32) -> (i32, i32) {
    %c0_i32 = arith.constant 0 : i32
    %c0_i32_0 = arith.constant 0 : i32
    %c0_i32_1 = arith.constant 0 : i32
    return %c0_i32, %c0_i32_0 : i32, i32
  }
  func.func @transform_7(%arg0: i32) -> (i32, i32) {
    %c0_i32 = arith.constant 0 : i32
    %c0_i32_0 = arith.constant 0 : i32
    %c0_i32_1 = arith.constant 0 : i32
    return %c0_i32, %c0_i32_0 : i32, i32
  }
  func.func @transform_8(%arg0: i32) -> (i32, i32) {
    %c0_i32 = arith.constant 0 : i32
    %c0_i32_0 = arith.constant 0 : i32
    %c0_i32_1 = arith.constant 0 : i32
    return %c0_i32, %c0_i32_0 : i32, i32
  }
  func.func @transform_9(%arg0: i32) -> (i32, i32) {
    %c0_i32 = arith.constant 0 : i32
    %c0_i32_0 = arith.constant 0 : i32
    %c0_i32_1 = arith.constant 0 : i32
    return %c0_i32, %c0_i32_0 : i32, i32
  }
  func.func @transform_10(%arg0: i32) -> (i32, i32) {
    %c0_i32 = arith.constant 0 : i32
    %c0_i32_0 = arith.constant 0 : i32
    %c0_i32_1 = arith.constant 0 : i32
    return %c0_i32, %c0_i32_0 : i32, i32
  }
  func.func @transform_11(%arg0: i32) -> (i32, i32, i32) {
    %c0_i32 = arith.constant 0 : i32
    %c0_i32_0 = arith.constant 0 : i32
    %c0_i32_1 = arith.constant 0 : i32
    return %arg0, %c0_i32, %c0_i32_0 : i32, i32, i32
  }
}

</mosaic_0001>

<bundles_post_ra>
// kernel: tpu_custom_call.1
= control target key start
LH: loop header
LB: loop body
LE: loop exit
PB: predicated region body
PF: predicated region fallthrough
CT: control target
= control target key end

     0   :  { %s2629_s0 = inlined_call_operand.hbm [shape: bf16[2,8,32], index: 0, kind: input, shape index: {}]   ;;  %s2630_s1 = inlined_call_operand.hbm [shape: bf16[2,8,32], index: 1, kind: input, shape index: {}]   ;;  %s2631_s2 = inlined_call_operand.hbm [shape: bf16[2,8,32], index: 2, kind: input, shape index: {}]   ;;  %s2632_s3 = inlined_call_operand.hbm [shape: bf16[32,32], index: 3, kind: input, shape index: {}]   ;;  %s2633_s4 = inlined_call_operand.vmem [shape: f32[1,32], index: 4, kind: input, shape index: {}]   ;;  %s2634_s5 = inlined_call_operand.vmem [shape: bf16[32,32], index: 5, kind: input, shape index: {}]   ;;  %s2635_s6 = inlined_call_operand.vmem [shape: f32[1,32], index: 6, kind: input, shape index: {}]   ;;  %s2636_s7 = inlined_call_operand.hbm [shape: bf16[32,32], index: 7, kind: input, shape index: {}]   ;;  %s2637_s8 = inlined_call_operand.hbm [shape: f32[1,32], index: 8, kind: input, shape index: {}]   ;;  %s2638_s9 = inlined_call_operand.vmem [shape: bf16[32,32], index: 9, kind: input, shape index: {}]   ;;  %s2639_s10 = inlined_call_operand.vmem [shape: f32[1,32], index: 10, kind: input, shape index: {}]   ;;  %s2640_s11 = inlined_call_operand.hbm [shape: f32[2,8,32], index: 11, kind: output, shape index: {}]  }
   0x1   :  { %2665 = sst [smem:[#allocation25_spill]] %s2630_s1 }
   0x2   :  { %2666 = sst [smem:[#allocation26_spill]] %s2632_s3 }
   0x3   :  { %2667 = sst [smem:[#allocation27_spill]] %s2633_s4 }
   0x4   :  { %2668 = sst [smem:[#allocation28_spill]] %s2638_s9 }
   0x5   :  { %2669 = sst [smem:[#allocation29_spill]] %s2639_s10 }
   0x6   :  { %2670 = sst [smem:[#allocation30_spill]] %s2640_s11 }
   0x7   :  { %16 = vsyncpa [#allocation3], 0 }
   0x8   :  { %18 = vsyncpa [#allocation3 + $0x1], 0 }
   0x9   :  { %19 = vsyncpa [#allocation6], 0 }
   0xa   :  { %21 = vsyncpa [#allocation6 + $0x1], 0 }
   0xb   :  { %22 = vsyncpa [#allocation9], 0 }
   0xc   :  { %23 = vsyncpa [#allocation12], 0 }
   0xd   :  { %24 = vsyncpa [#allocation4], 0 }
   0xe   :  { %26 = vsyncpa [#allocation4 + $0x1], 0  ;;  %s2155_s17 = smov 0   ;;  %s2157_s18 = smov 0  }
   0xf   :  { %s2159_s19 = smov 0   ;;  %s2161_s20 = smov 0  }
  0x10 LB: > { %2671 = sst [smem:[#allocation19_spill]] %s2067_s17  ;;  %s2176_s21 = sadd.s32 4294967295, %s2079_s20   ;;  %s2079_s20 = sphi %s2161_s20, %s2713_s20   ;;  %s2075_s19 = sphi %s2159_s19, %s2717_s19   ;;  %s2071_s18 = sphi %s2157_s18, %s2716_s18   ;;  %s2067_s17 = sphi %s2155_s17, %s2715_s17  }
  0x11   : > { %2672 = sst [smem:[#allocation20_spill]] %s2079_s20  ;;  %s1520_s22 = sadd.s32 4294967294, %s2079_s20  }
  0x12   : > { %p52_p0 = scmp.ne.s32.totalorder %s2071_s18, %s2067_s17  ;;  %p2643_p1 = scmp.eq.s32.totalorder %s2176_s21, 0 }
  0x13   : > { %p302_p3 = scmp.eq.s32.totalorder %s1520_s22, 1  ;;  %p1521_p5 = scmp.ge.s32.totalorder %s2079_s20, 1 }
  0x14   : > { %p2185_p4 = por %p2643_p1, %p52_p0  ;;  %p309_p7 = scmp.lt.s32.totalorder %s2079_s20, 3 }
  0x15   : > { %p2190_p6 = por %p302_p3, %p52_p0  ;;  %s2081_s26 = smov [#allocation8]  }
  0x16   : > { %s2673_s23 = scalar_select %p2185_p4, 1, 0 }
  0x17   : > { %s2674_s24 = scalar_select %p2190_p6, 1, 0 }
  0x18   : > { %p2195_p8 = pnand %p1521_p5, %p309_p7  ;;  %s321_s27 = sshll.u32 %s2081_s26, 4  ;;  %s2199_s27 = int_to_ptr.vmem [resolvable:$true] %s321_s27 }
  0x19   : > { %2675 = sst [smem:[#allocation21_spill]] %s2674_s24  ;;  %s2211_s29 = sadd.s32 1, %s2079_s20  }
  0x1a   : > { %s2676_s25 = scalar_select %p2195_p8, 1, 0 }
  0x1b   : > { %p1731_p9 = pneg %p2195_p8  ;;  %2678 = sst [smem:[#allocation22_spill]] %s2211_s29 }
  0x1c   : > { %s39_s30 = sadd.s32 1, %s2075_s19  ;;  %s36_s12 = ssub.s32 %s2079_s20, %s2211_s29 }
  0x1d   : > { %p2206_p11 = pnand %p1731_p9, %p2643_p1  ;;  %s2679_s3 = sld [smem:[#allocation26_spill]] }
  0x1f   : > { %s2677_s28 = scalar_select %p2206_p11, 1, 0 }
  0x20   : > { %p2224_p13 = pneg %p2206_p11 }
  0x22   : > { %s2680_s26 = scalar_select %p2224_p13, 1, 0 }
  0x23   : > { %s1827_s15 = scalar_lea.hbm %s2679_s3, 256 }
  0x24   : > { %p1828_p12 = scmp.ne.s32.totalorder %s2679_s3, %s1827_s15  ;;  %p1834_p5 = scmp.lt.u32.totalorder %s1827_s15, %s2679_s3 }
  0x26   : > { %p1830_p0 = pnand %p2224_p13, %p1828_p12 }
  0x28   : > { %p1831_p3 = pneg %p1830_p0 }
  0x2a   : > { %p1836_p7 = pnand %p1834_p5, %p1831_p3 }
  0x2c   : > { %1839 = shalt.err (!%p1836_p7)
}
  0x2d   : > { %s1840_s13 = scalar_lea.vmem %s2199_s27, 256  ;;  %p1848_p2 = scmp.lt.s32.totalorder %s2199_s27, %s2199_s27 }
  0x2e   : > { %p1841_p9 = scmp.ne.s32.totalorder %s2199_s27, %s1840_s13  ;;  %p1849_p6 = scmp.lt.s32.totalorder %s1840_s13, %s1840_s13 }
  0x30   : > { %p1843_p10 = pnand %p1841_p9, %p2224_p13  ;;  %p1850_p12 = por %p1849_p6, %p1848_p2 }
  0x32   : > { %p1844_p1 = pneg %p1843_p10 }
  0x34   : > { %p1851_p0 = pnand %p1850_p12, %p1844_p1 }
  0x36   : > { %1854 = shalt.err (!%p1851_p0)
}
  0x37   : > { %s2647_s14 = smov 64   ;;  %s2648_s17 = smov 4  }
  0x38   : > { %1734 = dma.hbm_to_vmem [thread:$0]  (!%p2206_p11), %s2679_s3, 256, %s2199_s27, [#allocation9], %s2647_s14, %s2647_s14, %s2648_s17  }
  0x39   : > { %p37_p1 = scmp.eq.s32.totalorder %s36_s12, 0  ;;  %p46_p2 = scmp.ne.s32.totalorder %s2075_s19, %s2071_s18 }
  0x3a   : > { %p47_p6 = scmp.eq.s32.totalorder %s2079_s20, 0  ;;  %p1758_p10 = scmp.lt.s32.totalorder %s2079_s20, 2 }
  0x3b   : > { %s2253_s16 = scalar_select %p37_p1, %s2075_s19, %s39_s30  }
  0x3c   : > { %p48_p3 = por %p47_p6, %p46_p2  ;;  %p2682_p5 = scmp.eq.s32.totalorder %s2176_s21, 1 }
  0x3d   : > { %2681 = sst [smem:[#allocation23_spill]] %s2253_s16  ;;  %s2649_s13 = sand.u32 1, %s2075_s19  }
  0x3e   : > { %p2257_p7 = por %p2682_p5, %p46_p2  ;;  %s2263_s29 = sshll.u32 %s2079_s20, 6 }
  0x3f   : > { %s2267_s11 = sshll.u32 %s2649_s13, 2  ;;  %p2269_p9 = pnand %p1758_p10, %p48_p3 }
  0x40   : > { %s2683_s22 = scalar_select %p2257_p7, 1, 0 }
  0x41   : > { %s2685_s27 = scalar_select %p2269_p9, 1, 0 }
  0x42   : > { %2684 = sst [smem:[#allocation24_spill]] %s2683_s22  ;;  %s392_s30 = sand.u32 1, %s2079_s20  }
  0x43   : > { %s2686_s1 = sld [smem:[#allocation25_spill]]  ;;  %s396_s14 = scalar_lea.vmem [#allocation5], %s2267_s11 }
  0x44   : > { %s403_s17 = sshll.u32 %s396_s14, 4  ;;  %s2283_s13 = scalar_lea.sflag [#allocation6], %s392_s30  ;;  %s2281_s17 = int_to_ptr.vmem [resolvable:$true] %s403_s17 }
  0x45   : > { %p2289_p0 = pneg %p2269_p9 }
  0x47   : > { %s2687_s16 = scalar_select %p2289_p0, 1, 0 }
  0x49   : > { %s2278_s15 = scalar_lea.hbm %s2686_s1, %s2263_s29  ;;  %s1860_s20 = scalar_lea.hbm %s2686_s1, 128 }
  0x4a   : > { %s1855_s3 = scalar_lea.hbm %s2278_s15, 64  ;;  %p1861_p6 = scmp.lt.u32.totalorder %s2278_s15, %s2686_s1 }
  0x4b   : > { %p1856_p12 = scmp.ne.s32.totalorder %s2278_s15, %s1855_s3  ;;  %p1862_p10 = scmp.lt.u32.totalorder %s1860_s20, %s1855_s3 }
  0x4c   : > { %p1864_p5 = scmp.lt.u32.totalorder %s1855_s3, %s2278_s15 }
  0x4d   : > { %p1858_p1 = pnand %p2289_p0, %p1856_p12  ;;  %p1863_p3 = por %p1862_p10, %p1861_p6 }
  0x4f   : > { %p1859_p2 = pneg %p1858_p1  ;;  %p1865_p7 = por %p1864_p5, %p1863_p3 }
  0x51   : > { %p1866_p4 = pnand %p1865_p7, %p1859_p2 }
  0x53   : > { %1869 = shalt.err (!%p1866_p4)
}
  0x54   : > { %s1870_s30 = scalar_lea.vmem %s2281_s17, 64  ;;  %s2084_s12 = smov [#allocation5]  }
  0x55   : > { %p1871_p12 = scmp.ne.s32.totalorder %s2281_s17, %s1870_s30  ;;  %s1875_s24 = sshll.u32 %s2084_s12, 4  ;;  %s1876_s24 = int_to_ptr.vmem [resolvable:$false] %s1875_s24 }
  0x56   : > { %s1877_s22 = scalar_lea.vmem %s1876_s24, 128  ;;  %p1878_p11 = scmp.lt.s32.totalorder %s2281_s17, %s1876_s24 }
  0x57   : > { %p1873_p1 = pnand %p1871_p12, %p2289_p0  ;;  %p1879_p13 = scmp.lt.s32.totalorder %s1877_s22, %s1870_s30 }
  0x59   : > { %p1874_p8 = pneg %p1873_p1  ;;  %p1880_p6 = por %p1879_p13, %p1878_p11 }
  0x5b   : > { %p1881_p10 = pnand %p1880_p6, %p1874_p8 }
  0x5d   : > { %1884 = shalt.err (!%p1881_p10)
}
  0x5e   : > { %1747 = dma.hbm_to_vmem [thread:$0]  (!%p2269_p9), %s2278_s15, 64, %s2281_s17, %s2283_s13  }
  0x5f   : > { %s2085_s3 = smov [#allocation10]   ;;  %s2086_s14 = smov [#allocation11]  }
  0x60   : > { %s343_s20 = sshll.u32 %s2085_s3, 4  ;;  %s357_s1 = sshll.u32 %s2086_s14, 4  ;;  %s344_s20 = int_to_ptr.vmem [resolvable:$true] %s343_s20  ;;  %s358_s1 = int_to_ptr.vmem [resolvable:$true] %s357_s1 }
  0x61   : > { %s1885_s24 = scalar_lea.hbm %s2636_s7, 256  ;;  %p2688_p8 = scmp.ne.s32.totalorder %s2680_s26, 0 }
  0x62   : > { %p1886_p4 = scmp.ne.s32.totalorder %s2636_s7, %s1885_s24  ;;  %p1892_p7 = scmp.lt.u32.totalorder %s1885_s24, %s2636_s7 }
  0x64   : > { %p1888_p11 = pnand %p1886_p4, %p2688_p8 }
  0x66   : > { %p1889_p13 = pneg %p1888_p11 }
  0x68   : > { %p1894_p2 = pnand %p1892_p7, %p1889_p13 }
  0x6a   : > { %1897 = shalt.err (!%p1894_p2)
}
  0x6b   : > { %s1898_s17 = scalar_lea.vmem %s344_s20, 256  ;;  %p1906_p1 = scmp.lt.s32.totalorder %s344_s20, %s344_s20 }
  0x6c   : > { %p1899_p3 = scmp.ne.s32.totalorder %s344_s20, %s1898_s17  ;;  %p1907_p6 = scmp.lt.s32.totalorder %s1898_s17, %s1898_s17 }
  0x6e   : > { %p1901_p5 = pnand %p1899_p3, %p2688_p8  ;;  %p1908_p10 = por %p1907_p6, %p1906_p1 }
  0x70   : > { %p1902_p12 = pneg %p1901_p5 }
  0x72   : > { %p1909_p9 = pnand %p1908_p10, %p1902_p12 }
  0x74   : > { %1912 = shalt.err (!%p1909_p9)
}
  0x75   : > { %p2689_p4 = scmp.ne.s32.totalorder %s2677_s28, 0  ;;  %s2690_s10 = smov 4  }
  0x76   : > { %s2691_s15 = smov 64   ;;  %s1913_s12 = scalar_lea.hbm %s2637_s8, 16 }
  0x77   : > { %1737 = dma.hbm_to_vmem [thread:$0]  (!%p2689_p4), %s2636_s7, 256, %s344_s20, [#allocation9], %s2691_s15, %s2691_s15, %s2690_s10  }
  0x78   : > { %p1914_p11 = scmp.ne.s32.totalorder %s2637_s8, %s1913_s12  ;;  %p1920_p7 = scmp.lt.u32.totalorder %s1913_s12, %s2637_s8 }
  0x7a   : > { %p1916_p9 = pnand %p1914_p11, %p2688_p8 }
  0x7c   : > { %p1917_p13 = pneg %p1916_p9 }
  0x7e   : > { %p1922_p2 = pnand %p1920_p7, %p1917_p13 }
  0x80   : > { %1925 = shalt.err (!%p1922_p2)
}
  0x81   : > { %s1926_s4 = scalar_lea.vmem %s358_s1, 16  ;;  %s1933_s20 = scalar_lea.vmem %s358_s1, 32 }
  0x82   : > { %p1927_p3 = scmp.ne.s32.totalorder %s358_s1, %s1926_s4  ;;  %p1934_p1 = scmp.lt.s32.totalorder %s358_s1, %s358_s1 }
  0x83   : > { %p1935_p6 = scmp.lt.s32.totalorder %s1933_s20, %s1926_s4 }
  0x84   : > { %p1929_p5 = pnand %p1927_p3, %p2688_p8 }
  0x85   : > { %p1936_p10 = por %p1935_p6, %p1934_p1 }
  0x86   : > { %p1930_p12 = pneg %p1929_p5 }
  0x88   : > { %p1937_p0 = pnand %p1936_p10, %p1930_p12 }
  0x8a   : > { %1940 = shalt.err (!%p1937_p0)
}
  0x8b   : > { %1740 = dma.hbm_to_vmem [thread:$0]  (!%p2689_p4), %s2637_s8, 16, %s358_s1, [#allocation12]  }
  0x8c   : > { %s2356_s3 = scalar_lea.hbm %s2629_s0, %s2263_s29  ;;  %s378_s14 = scalar_lea.vmem [#allocation2], %s2267_s11 }
  0x8d   : > { %s385_s28 = sshll.u32 %s378_s14, 4  ;;  %s2365_s30 = scalar_lea.hbm %s2631_s2, %s2263_s29  ;;  %s2359_s28 = int_to_ptr.vmem [resolvable:$true] %s385_s28 }
  0x8e   : > { %s2692_s22 = sand.u32 1, %s2075_s19   ;;  %s1941_s17 = scalar_lea.hbm %s2356_s3, 64 }
  0x8f   : > { %s375_s1 = scalar_lea.sflag [#allocation3], %s2692_s22  ;;  %p1942_p0 = scmp.ne.s32.totalorder %s2356_s3, %s1941_s17 }
  0x90   : > { %p2693_p8 = scmp.ne.s32.totalorder %s2687_s16, 0  ;;  %s1946_s10 = scalar_lea.hbm %s2629_s0, 128 }
  0x91   : > { %p1947_p9 = scmp.lt.u32.totalorder %s2356_s3, %s2629_s0  ;;  %p1948_p13 = scmp.lt.u32.totalorder %s1946_s10, %s1941_s17 }
  0x92   : > { %p1944_p4 = pnand %p1942_p0, %p2693_p8  ;;  %p1950_p2 = scmp.lt.u32.totalorder %s1941_s17, %s2356_s3 }
  0x93   : > { %p1949_p7 = por %p1948_p13, %p1947_p9 }
  0x94   : > { %p1945_p11 = pneg %p1944_p4 }
  0x95   : > { %p1951_p3 = por %p1950_p2, %p1949_p7 }
  0x97   : > { %p1952_p5 = pnand %p1951_p3, %p1945_p11 }
  0x99   : > { %1955 = shalt.err (!%p1952_p5)
}
  0x9a   : > { %s1956_s29 = scalar_lea.vmem %s2359_s28, 64  ;;  %s2087_s9 = smov [#allocation2]  }
  0x9b   : > { %p1957_p12 = scmp.ne.s32.totalorder %s2359_s28, %s1956_s29  ;;  %s1961_s14 = sshll.u32 %s2087_s9, 4  ;;  %s1962_s14 = int_to_ptr.vmem [resolvable:$false] %s1961_s14 }
  0x9c   : > { %s1963_s12 = scalar_lea.vmem %s1962_s14, 128  ;;  %p1964_p10 = scmp.lt.s32.totalorder %s2359_s28, %s1962_s14 }
  0x9d   : > { %p1959_p1 = pnand %p1957_p12, %p2693_p8  ;;  %p1965_p0 = scmp.lt.s32.totalorder %s1963_s12, %s1956_s29 }
  0x9f   : > { %p1960_p6 = pneg %p1959_p1  ;;  %p1966_p4 = por %p1965_p0, %p1964_p10 }
  0xa1   : > { %p1967_p9 = pnand %p1966_p4, %p1960_p6 }
  0xa3   : > { %1970 = shalt.err (!%p1967_p9)
}
  0xa4   : > { %p2694_p11 = scmp.ne.s32.totalorder %s2685_s27, 0  ;;  %s414_s24 = scalar_lea.vmem [#allocation7], %s2267_s11 }
  0xa5   : > { %s421_s22 = sshll.u32 %s414_s24, 4  ;;  %s1971_s17 = scalar_lea.hbm %s2365_s30, 64  ;;  %s422_s22 = int_to_ptr.vmem [resolvable:$true] %s421_s22 }
  0xa6   : > { %1744 = dma.hbm_to_vmem [thread:$0]  (!%p2694_p11), %s2356_s3, 64, %s2359_s28, %s375_s1  }
  0xa7   : > { %p1972_p13 = scmp.ne.s32.totalorder %s2365_s30, %s1971_s17  ;;  %s1976_s10 = scalar_lea.hbm %s2631_s2, 128 }
  0xa8   : > { %p1977_p3 = scmp.lt.u32.totalorder %s2365_s30, %s2631_s2  ;;  %p1978_p5 = scmp.lt.u32.totalorder %s1976_s10, %s1971_s17 }
  0xa9   : > { %p1974_p7 = pnand %p1972_p13, %p2693_p8  ;;  %p1980_p1 = scmp.lt.u32.totalorder %s1971_s17, %s2365_s30 }
  0xaa   : > { %p1979_p12 = por %p1978_p5, %p1977_p3 }
  0xab   : > { %p1975_p2 = pneg %p1974_p7 }
  0xac   : > { %p1981_p6 = por %p1980_p1, %p1979_p12 }
  0xae   : > { %p1982_p10 = pnand %p1981_p6, %p1975_p2 }
  0xb0   : > { %1985 = shalt.err (!%p1982_p10)
}
  0xb1   : > { %s1986_s11 = scalar_lea.vmem %s422_s22, 64  ;;  %s2088_s3 = smov [#allocation7]  }
  0xb2   : > { %p1987_p0 = scmp.ne.s32.totalorder %s422_s22, %s1986_s11  ;;  %s1991_s28 = sshll.u32 %s2088_s3, 4  ;;  %s1992_s28 = int_to_ptr.vmem [resolvable:$false] %s1991_s28 }
  0xb3   : > { %s1993_s1 = scalar_lea.vmem %s1992_s28, 128  ;;  %p1994_p13 = scmp.lt.s32.totalorder %s422_s22, %s1992_s28 }
  0xb4   : > { %p1989_p4 = pnand %p1987_p0, %p2693_p8  ;;  %p1995_p7 = scmp.lt.s32.totalorder %s1993_s1, %s1986_s11 }
  0xb6   : > { %p1990_p9 = pneg %p1989_p4  ;;  %p1996_p11 = por %p1995_p7, %p1994_p13 }
  0xb8   : > { %p1997_p3 = pnand %p1996_p11, %p1990_p9 }
  0xba   : > { %2000 = shalt.err (!%p1997_p3)
}
  0xbb   : > { %p2695_p5 = scmp.ne.s32.totalorder %s2685_s27, 0  ;;  %p2696_p2 = scmp.ne.s32.totalorder %s2676_s25, 0 }
  0xbc   : > { %s2412_s16 = sand.u32 (!%p2696_p2), 1, %s2071_s18   ;;  %p2697_p8 = scmp.ne.s32.totalorder (!%p2696_p2), %s2673_s23, 0 }
  0xbd   : > { %1750 = dma.hbm_to_vmem [thread:$0]  (!%p2695_p5), %s2365_s30, 64, %s422_s22, %s2283_s13  }
  0xbe   : > { %430 = sbr.rel (%p2696_p2) target bundleno = 2491 (0x9bb), region = 64  ;;  %s2415_s29 = sshll.u32 (!%p2696_p2), %s2412_s16, 2 }
  0xbf   : > { %s433_s9 = scalar_lea.sflag (!%p2696_p2), [#allocation3], %s2412_s16  ;;  %s436_s14 = scalar_lea.vmem (!%p2696_p2), [#allocation2], %s2415_s29 }
  0xc5   : > { %2046 = dma.done.wait (%p2697_p8), %s433_s9, 64  }
  0xc6   : > { %2048 = vsyncadd (%p2697_p8), %s433_s9, 4294967232  ;;  %s441_s25 = sand.u32 1, %s2176_s21   ;;  %s445_s27 = scalar_lea.vmem [#allocation5], %s2415_s29 }
  0xc7   : > { %s442_s13 = scalar_lea.sflag [#allocation6], %s441_s25 }
  0xc8   : > { %2050 = dma.done.wait (%p2697_p8), %s442_s13, 128  }
  0xc9   : > { %2052 = vsyncadd (%p2697_p8), %s442_s13, 4294967168  ;;  %s454_s30 = scalar_lea.vmem [#allocation7], %s2415_s29  ;;  %p2698_p11 = scmp.eq.s32.totalorder %s2176_s21, 0 }
  0xcb   : > { %2054 = dma.done.wait (%p2698_p11), [#allocation9], 512   ;;  %p2699_p12 = pmov %p2698_p11 }
  0xcc   : > { %p2700_p1 = pmov %p2698_p11 }
  0xcd   : > { %2056 = vsyncadd (%p2699_p12), [#allocation9], 4294966784 }
  0xce   : > { %2058 = dma.done.wait (%p2700_p1), [#allocation12], 16   ;;  %p2701_p6 = pmov %p2700_p1 }
  0xcf   : > { %v2089_v0 = vmov 0.0   ;;  %vm2090_vm0 = vmmov 0   ;;  %v1805_v1 = vld [vmem:[%s2634_s5] sm:$0xff]   ;;  %v1806_v2 = vld [vmem:[%s2634_s5 + $0x8] sm:$0xff]   ;;  %v1807_v3 = vld [vmem:[#allocation8] sm:$0xff]   ;;  %vm557_vm1 = vcmask 261120  }
  0xd0   : > { %2060 = vsyncadd (%p2701_p6), [#allocation12], 4294967280  ;;  %1610 = vmatprep.subr.bf16.mxu1 %v2089_v0  ;;  %1602 = vmatprep.subr.bf16.mxu0 %v2089_v0  ;;  %v1808_v4 = vld [vmem:[#allocation8 + $0x8] sm:$0xff]   ;;  %v517_v5 = vld [vmem:[%s445_s27] sm:$0xf]  ;;  %s2702_s15 = sld [smem:[#allocation27_spill]] }
  0xd1   : > { %1614 = vmatprep.mubr.msk.bf16.mxu1 %vm2090_vm0, %v2089_v0  ;;  %1606 = vmatprep.mubr.msk.bf16.mxu0 %vm2090_vm0, %v2089_v0  ;;  %v516_v6 = vld [vmem:[%s436_s14] sm:$0xf]  ;;  %vm732_vm2 = vcmask 64512   ;;  %s2091_s26 = smov 120   ;;  %s2092_s11 = smov 112   ;;  %v1809_v22 = vld [vmem:[#allocation10] sm:$0xff]  }
  0xd2   : > { %1611 = vmatpush3.bf16.msra.mxu1 %v1805_v1  ;;  %1603 = vmatpush3.bf16.msra.mxu0 %v1807_v3  ;;  %v1544_v7 = vld [vmem:[%s2635_s6] ss:$0 sm:$0xff]  ;;  %v1810_v23 = vld [vmem:[#allocation10 + $0x8] sm:$0xff]   ;;  %v1548_v39 = vld [vmem:[#allocation11] ss:$0 sm:$0xff]  ;;  %vm794_vm3 = vcmask 1043456  }
  0xd3   : > { %1612 = vmatprep.subr.bf16.mxu1 %v2089_v0  ;;  %1604 = vmatprep.subr.bf16.mxu0 %v2089_v0  ;;  %v518_v24 = vld [vmem:[%s454_s30] sm:$0xf]  ;;  %s2703_s1 = sld [smem:[#allocation28_spill]]  ;;  %s2093_s29 = smov 104  }
  0xd4   : > { %s1539_s23 = sshll.u32 %s2412_s16, 3  ;;  %s2704_s22 = sld [smem:[#allocation29_spill]] }
  0xd5   : > { %s2705_s17 = sld [smem:[#allocation24_spill]]  ;;  %s1566_s4 = sshll.u32 %s2176_s21, 7 }
  0xd6   : > { %1613 = vmatpush3.bf16.msra.mxu1 %v1806_v2  ;;  %1605 = vmatpush3.bf16.msra.mxu0 %v1808_v4  ;;  %v1540_v9 = vld [vmem:[%s2702_s15] ss:$0 sm:$0xff]  ;;  %s514_s20 = scalar_lea.vmem [#allocation13], %s1539_s23  ;;  %s1365_s21 = scalar_lea.sflag [#allocation4], %s2412_s16 }
  0xd7   : > { %1626 = vmatprep.subr.bf16.mxu1 %v2089_v0  ;;  %1618 = vmatprep.subr.bf16.mxu0 %v2089_v0  ;;  %s1378_s10 = sshll.u32 %s514_s20, 4  ;;  %s2586_s10 = int_to_ptr.vmem [resolvable:$true] %s1378_s10 }
  0xd8   : > { %s2001_s28 = scalar_lea.vmem %s2586_s10, 128 }
  0xd9   : > { %1615 = vmatmul.mubr.msk.bf16.vlgmr.msra.gmra.mrb[0].mxu1 %vm557_vm1, %v517_v5  ;;  %1607 = vmatmul.mubr.msk.bf16.vlgmr.msra.gmra.mrb[0].mxu0 %vm557_vm1, %v516_v6  ;;  %v531_v53 = vld [vmem:[%s2703_s1] sm:$0xf]  ;;  %p2002_p10 = scmp.ne.s32.totalorder %s2586_s10, %s2001_s28 }
  0xda   : > { %1628 = vmatprep.mubr.msk.bf16.mxu1 %vm2090_vm0, %v2089_v0  ;;  %1622 = vmatprep.mubr.msk.bf16.mxu0 %vm2090_vm0, %v2089_v0  ;;  %v843_v54 = vsel %vm794_vm3, %v531_v53, 0 }
  0xdb   : > { %1619 = vmatpush3.bf16.msra.mxu0 %v1809_v22  ;;  %p2707_p0 = scmp.ne.s32.totalorder %s2705_s17, 0 }
  0xdc   : > { %1620 = vmatprep.subr.bf16.mxu0 %v2089_v0 }
  0xdd   : > { %p2003_p4 = pnand %p2002_p10, %p2707_p0 }
  0xdf   : > { %1621 = vmatpush3.bf16.msra.mxu0 %v1810_v23  ;;  %p2004_p9 = pneg %p2003_p4 }
  0xe0   : > { %1632 = vmatprep.subr.bf16.mxu0 %v2089_v0 }
  0xe2   : > { %1623 = vmatmul.mubr.msk.bf16.vlgmr.msra.gmra.mrb[4].mxu0 %vm557_vm1, %v518_v24 }
  0xe3   : > { %1634 = vmatprep.mubr.msk.bf16.mxu0 %vm2090_vm0, %v2089_v0 }
 0x1ac   : > { %v657_v8 = vpop.f32.mrb[0].mxu1  ;;  %v595_v13 = vpop.f32.mrb[0].mxu0 }
 0x1ad   : > { %v658_v10 = vadd.f32 %v1544_v7, %v657_v8  ;;  %v1616_v11 = vpop.f32.mrb[1].mxu1  ;;  %v596_v16 = vadd.f32 %v1540_v9, %v595_v13  ;;  %v1608_v17 = vpop.f32.mrb[1].mxu0 }
 0x1ae   : > { %v660_v12 = vpop.f32.mrb[2].mxu1  ;;  %v598_v18 = vpop.f32.mrb[2].mxu0 }
 0x1af   : > { %v2468_v14 = vpack.c.bf16 %v658_v10, %v658_v10  ;;  %v1617_v15 = vpop.f32.mrb[3].mxu1  ;;  %v2472_v19 = vpack.c.bf16 %v596_v16, %v596_v16  ;;  %v1609_v21 = vpop.f32.mrb[3].mxu0 }
 0x1b1   : > { %890 = vrot.lane.b32.xlu1 %v2468_v14, %s2091_s26  ;;  %v737_v20 = vsel %vm732_vm2, %v2468_v14, 0 }
 0x1b2   : > { %1627 = vmatpush3.bf16.xpose.msra.mxu1 %v737_v20 }
 0x1b3   : > { %1638 = vmatprep.subr.bf16.mxu1 %v2089_v0 }
 0x1b5   : > { %887 = vrot.lane.b32.xlu1 %v2472_v19, %s2091_s26  ;;  %v719_v30 = vpop.f32.mrb[4].mxu0 }
 0x1b6   : > { %v1624_v31 = vpop.f32.mrb[5].mxu0  ;;  %v720_v40 = vadd.f32 %v1548_v39, %v719_v30 }
 0x1b7   : > { %v722_v32 = vpop.f32.mrb[6].mxu0 }
 0x1b8   : > { %v1625_v33 = vpop.f32.mrb[7].mxu0  ;;  %v2494_v41 = vpack.c.bf16 %v720_v40, %v720_v40  ;;  %v532_v32 = vld [vmem:[%s2703_s1 + $0x4] sm:$0xf] }
 0x1b9   : > { %1629 = vmatmul.mubr.msk.bf16.vlgmr.msra.gmra.mrb[4].mxu1 %vm732_vm2, %v2472_v19  ;;  %1047 = vrot.lane.b32.xlu1 %v2472_v19, %s2092_s11  ;;  %v1004_v33 = vsel %vm794_vm3, %v532_v32, 0 }
 0x1ba   : > { %1640 = vmatprep.mubr.msk.bf16.mxu1 %vm2090_vm0, %v2089_v0  ;;  %v796_v42 = vsel %vm794_vm3, %v2494_v41, 0  ;;  %1639 = vmatpush3.bf16.msra.mxu1 %v843_v54 }
 0x1bb   : > { %1633 = vmatpush3.bf16.msra.mxu0 %v796_v42  ;;  %1650 = vmatprep.subr.bf16.mxu1 %v2089_v0 }
 0x1bc   : > { %1644 = vmatprep.subr.bf16.mxu0 %v2089_v0 }
 0x223   : > { %v891_v46 = vpop.permute.xlu1 %890 }
 0x224   : > { %v896_v48 = vsel %vm732_vm2, %v891_v46, 0 }
 0x227   : > { %v888_v50 = vpop.permute.xlu1 %887 }
 0x22b   : > { %v1048_v52 = vpop.permute.xlu1 %1047 }
 0x28c   : > { %v773_v25 = vpop.f32.mrb[4].mxu1 }
 0x28d   : > { %v1630_v26 = vpop.f32.mrb[5].mxu1  ;;  %v779_v27 = vsel %vm732_vm2, %v773_v25, -inf }
 0x28e   : > { %780 = vmax.xlane.f32.xlu0 %v779_v27  ;;  %v776_v28 = vpop.f32.mrb[6].mxu1 }
 0x28f   : > { %v1631_v29 = vpop.f32.mrb[7].mxu1 }
 0x31b   : > { %v781_v34 = vpop.xlane.xlu0 %780 }
 0x31c   : > { %v782_v35 = vsub.f32 %v773_v25, %v781_v34 }
 0x31e   : > { %v783_v36 = vmul.f32 1.442695, %v782_v35 }
 0x320   : > { %1811 = vpow2.f32 %v783_v36 }
 0x32a   : > { %v1812_v37 = vpop.eup %1811 }
 0x32b   : > { %v785_v38 = vsel %vm732_vm2, %v1812_v37, 0.0 }
 0x32c   : > { %786 = vadd.xlane.f32.xlu0 %v785_v38 }
 0x342   : > { %1049 = vrot.lane.b32.xlu0 %v2468_v14, %s2092_s11 }
 0x3b9   : > { %v787_v43 = vpop.xlane.xlu0 %786 }
 0x3ba   : > { %1813 = vrcp.f32 %v787_v43 }
 0x3bd   : > { %v1050_v49 = vpop.permute.xlu0 %1049 }
 0x3be   : > { %v1055_v51 = vsel %vm732_vm2, %v1050_v49, 0 }
 0x3c4   : > { %v1814_v44 = vpop.eup %1813 }
 0x3c5   : > { %v789_v45 = vmul.f32 %v1814_v44, %v1812_v37  ;;  %v533_v44 = vld [vmem:[%s2703_s1 + $0x8] sm:$0xf] }
 0x3c7   : > { %v790_v47 = vpack.c.bf16 %v789_v45, %v789_v45 }
 0x3c9   : > { %1635 = vmatmul.mubr.msk.bf16.vlgmr.msra.gmra.mrb[8].mxu0 %vm732_vm2, %v790_v47 }
 0x3ca   : > { %1645 = vmatpush3.bf16.xpose.msra.mxu0 %v896_v48  ;;  %1646 = vmatprep.mubr.msk.bf16.mxu0 %vm2090_vm0, %v2089_v0  ;;  %v1162_v48 = vsel %vm794_vm3, %v533_v44, 0 }
 0x3cb   : > { %1662 = vmatprep.subr.bf16.mxu0 %v2089_v0 }
 0x3d1   : > { %1647 = vmatmul.mubr.msk.bf16.vlgmr.msra.gmra.mrb[12].mxu0 %vm732_vm2, %v888_v50 }
 0x3d2   : > { %1663 = vmatpush3.bf16.xpose.msra.mxu0 %v1055_v51  ;;  %1664 = vmatprep.mubr.msk.bf16.mxu0 %vm2090_vm0, %v2089_v0 }
 0x3d3   : > { %1668 = vmatprep.subr.bf16.mxu0 %v2089_v0 }
 0x3d9   : > { %1665 = vmatmul.mubr.msk.bf16.vlgmr.msra.gmra.mrb[16].mxu0 %vm732_vm2, %v1048_v52 }
 0x3da   : > { %1670 = vmatprep.mubr.msk.bf16.mxu0 %vm2090_vm0, %v2089_v0 }
 0x49c   : > { %v832_v55 = vpop.f32.mrb[8].mxu0 }
 0x49d   : > { %v838_v56 = vpack.c.bf16 %v832_v55, %v832_v55  ;;  %v1636_v57 = vpop.f32.mrb[9].mxu0 }
 0x49e   : > { %v835_v58 = vpop.f32.mrb[10].mxu0 }
 0x49f   : > { %v1637_v59 = vpop.f32.mrb[11].mxu0  ;;  %1641 = vmatmul.mubr.msk.bf16.vlgmr.msra.gmra.mrb[8].mxu1 %vm732_vm2, %v838_v56 }
 0x4a0   : > { %1652 = vmatprep.mubr.msk.bf16.mxu1 %vm2090_vm0, %v2089_v0 }
 0x4a4   : > { %v932_v60 = vpop.f32.mrb[12].mxu0 }
 0x4a5   : > { %v1648_v61 = vpop.f32.mrb[13].mxu0  ;;  %v938_v6 = vsel %vm732_vm2, %v932_v60, -inf }
 0x4a6   : > { %v935_v62 = vpop.f32.mrb[14].mxu0  ;;  %v534_v61 = vld [vmem:[%s2703_s1 + $0xc] sm:$0xf] }
 0x4a7   : > { %v1649_v63 = vpop.f32.mrb[15].mxu0 }
 0x4ac   : > { %v1091_v1 = vpop.f32.mrb[16].mxu0 }
 0x4ad   : > { %v1666_v2 = vpop.f32.mrb[17].mxu0  ;;  %v1097_v3 = vsel %vm732_vm2, %v1091_v1, -inf }
 0x4ae   : > { %1098 = vmax.xlane.f32.xlu1 %v1097_v3  ;;  %v1094_v4 = vpop.f32.mrb[18].mxu0 }
 0x4af   : > { %v1667_v5 = vpop.f32.mrb[19].mxu0 }
 0x4bf   : > { %1109 = vrot.lane.b32.xlu1 %v2494_v41, %s2092_s11  ;;  %s2706_s11 = sld [smem:[#allocation30_spill]] }
 0x4c3   : > { %1205 = vrot.lane.b32.xlu1 %v2472_v19, %s2093_s29 }
 0x4c5   : > { %s2584_s3 = scalar_lea.hbm %s2706_s11, %s1566_s4 }
 0x4e7   : > { %939 = vmax.xlane.f32.xlu1 %v938_v6  ;;  %v1552_v6 = vld [vmem:[%s2704_s22] ss:$0 sm:$0xff] }
 0x4f8   : > { %951 = vrot.lane.b32.xlu1 %v2494_v41, %s2091_s26 }
 0x53b   : > { %v1099_v7 = vpop.xlane.xlu1 %1098 }
 0x53c   : > { %v1100_v8 = vsub.f32 %v1091_v1, %v1099_v7  ;;  %v1320_v1 = vsel %vm794_vm3, %v534_v61, 0 }
 0x53e   : > { %v1101_v9 = vmul.f32 1.442695, %v1100_v8 }
 0x53f   : > { %v1110_v10 = vpop.permute.xlu1 %1109 }
 0x540   : > { %1815 = vpow2.f32 %v1101_v9  ;;  %v1115_v11 = vsel %vm794_vm3, %v1110_v10, 0 }
 0x541   : > { %1669 = vmatpush3.bf16.msra.mxu0 %v1115_v11 }
 0x542   : > { %1680 = vmatprep.subr.bf16.mxu0 %v2089_v0 }
 0x543   : > { %v1206_v15 = vpop.permute.xlu1 %1205 }
 0x54a   : > { %v1816_v12 = vpop.eup %1815 }
 0x54b   : > { %v1103_v13 = vsel %vm732_vm2, %v1816_v12, 0.0 }
 0x54c   : > { %1104 = vadd.xlane.f32.xlu0 %v1103_v13 }
 0x562   : > { %1207 = vrot.lane.b32.xlu0 %v2468_v14, %s2093_s29 }
 0x574   : > { %v940_v16 = vpop.xlane.xlu1 %939 }
 0x575   : > { %v941_v17 = vsub.f32 %v932_v60, %v940_v16 }
 0x577   : > { %v942_v18 = vmul.f32 1.442695, %v941_v17 }
 0x578   : > { %v952_v19 = vpop.permute.xlu1 %951 }
 0x579   : > { %1817 = vpow2.f32 %v942_v18  ;;  %v957_v20 = vsel %vm794_vm3, %v952_v19, 0 }
 0x57a   : > { %1651 = vmatpush3.bf16.msra.mxu1 %v957_v20 }
 0x57b   : > { %1656 = vmatprep.subr.bf16.mxu1 %v2089_v0 }
 0x583   : > { %v1818_v21 = vpop.eup %1817 }
 0x584   : > { %v944_v22 = vsel %vm732_vm2, %v1818_v21, 0.0 }
 0x585   : > { %945 = vadd.xlane.f32.xlu0 %v944_v22 }
 0x5d9   : > { %v1105_v23 = vpop.xlane.xlu0 %1104 }
 0x5da   : > { %1819 = vrcp.f32 %v1105_v23 }
 0x5dd   : > { %v1208_v14 = vpop.permute.xlu0 %1207 }
 0x5de   : > { %v1213_v27 = vsel %vm732_vm2, %v1208_v14, 0 }
 0x5e4   : > { %v1820_v24 = vpop.eup %1819 }
 0x5e5   : > { %v1107_v25 = vmul.f32 %v1820_v24, %v1816_v12 }
 0x5e7   : > { %v1108_v26 = vpack.c.bf16 %v1107_v25, %v1107_v25 }
 0x5e9   : > { %1671 = vmatmul.mubr.msk.bf16.vlgmr.msra.gmra.mrb[20].mxu0 %vm732_vm2, %v1108_v26 }
 0x5ea   : > { %1681 = vmatpush3.bf16.xpose.msra.mxu0 %v1213_v27  ;;  %1682 = vmatprep.mubr.msk.bf16.mxu0 %vm2090_vm0, %v2089_v0 }
 0x5f1   : > { %1683 = vmatmul.mubr.msk.bf16.vlgmr.msra.gmra.mrb[24].mxu0 %vm732_vm2, %v1206_v15 }
 0x612   : > { %v946_v28 = vpop.xlane.xlu0 %945 }
 0x613   : > { %1821 = vrcp.f32 %v946_v28 }
 0x61d   : > { %v1822_v29 = vpop.eup %1821 }
 0x61e   : > { %v948_v30 = vmul.f32 %v1822_v29, %v1818_v21 }
 0x620   : > { %v949_v31 = vpack.c.bf16 %v948_v30, %v948_v30 }
 0x622   : > { %1653 = vmatmul.mubr.msk.bf16.vlgmr.msra.gmra.mrb[12].mxu1 %vm732_vm2, %v949_v31 }
 0x623   : > { %1658 = vmatprep.mubr.msk.bf16.mxu1 %vm2090_vm0, %v2089_v0  ;;  %1657 = vmatpush3.bf16.msra.mxu1 %v1004_v33 }
 0x624   : > { %1674 = vmatprep.subr.bf16.mxu1 %v2089_v0 }
 0x6bc   : > { %v1151_v34 = vpop.f32.mrb[20].mxu0 }
 0x6bd   : > { %v1672_v35 = vpop.f32.mrb[21].mxu0  ;;  %v1157_v51 = vpack.c.bf16 %v1151_v34, %v1151_v34 }
 0x6be   : > { %v1154_v36 = vpop.f32.mrb[22].mxu0 }
 0x6bf   : > { %v1673_v37 = vpop.f32.mrb[23].mxu0 }
 0x6c4   : > { %v1249_v38 = vpop.f32.mrb[24].mxu0 }
 0x6c5   : > { %v1684_v39 = vpop.f32.mrb[25].mxu0  ;;  %v1255_v40 = vsel %vm732_vm2, %v1249_v38, -inf }
 0x6c6   : > { %1256 = vmax.xlane.f32.xlu0 %v1255_v40  ;;  %v1252_v42 = vpop.f32.mrb[26].mxu0 }
 0x6c7   : > { %v1685_v43 = vpop.f32.mrb[27].mxu0 }
 0x6f5   : > { %v993_v45 = vpop.f32.mrb[12].mxu1 }
 0x6f6   : > { %v999_v46 = vpack.c.bf16 %v993_v45, %v993_v45  ;;  %v1654_v47 = vpop.f32.mrb[13].mxu1 }
 0x6f7   : > { %v996_v49 = vpop.f32.mrb[14].mxu1 }
 0x6f8   : > { %v1655_v50 = vpop.f32.mrb[15].mxu1  ;;  %1659 = vmatmul.mubr.msk.bf16.vlgmr.msra.gmra.mrb[8].mxu1 %vm732_vm2, %v999_v46 }
 0x6f9   : > { %1675 = vmatpush3.bf16.msra.mxu1 %v1162_v48  ;;  %1676 = vmatprep.mubr.msk.bf16.mxu1 %vm2090_vm0, %v2089_v0 }
 0x6fa   : > { %1686 = vmatprep.subr.bf16.mxu1 %v2089_v0 }
 0x704   : > { %1677 = vmatmul.mubr.msk.bf16.vlgmr.msra.gmra.mrb[8].mxu1 %vm732_vm2, %v1157_v51 }
 0x705   : > { %1688 = vmatprep.mubr.msk.bf16.mxu1 %vm2090_vm0, %v2089_v0 }
 0x753   : > { %v1257_v52 = vpop.xlane.xlu0 %1256 }
 0x754   : > { %v1258_v53 = vsub.f32 %v1249_v38, %v1257_v52 }
 0x756   : > { %v1259_v54 = vmul.f32 1.442695, %v1258_v53 }
 0x758   : > { %1823 = vpow2.f32 %v1259_v54 }
 0x762   : > { %v1824_v55 = vpop.eup %1823 }
 0x763   : > { %v1261_v56 = vsel %vm732_vm2, %v1824_v55, 0.0 }
 0x764   : > { %1262 = vadd.xlane.f32.xlu0 %v1261_v56 }
 0x77a   : > { %1267 = vrot.lane.b32.xlu0 %v2494_v41, %s2093_s29  ;;  %s2094_s29 = smov [#allocation13]  }
 0x77b   : > { %s2005_s9 = sshll.u32 %s2094_s29, 4  ;;  %s2006_s9 = int_to_ptr.vmem [resolvable:$false] %s2005_s9 }
 0x77c   : > { %s2007_s14 = scalar_lea.vmem %s2006_s9, 256  ;;  %p2008_p13 = scmp.lt.s32.totalorder %s2586_s10, %s2006_s9 }
 0x77d   : > { %p2009_p7 = scmp.lt.s32.totalorder %s2007_s14, %s2001_s28 }
 0x77f   : > { %p2010_p3 = por %p2009_p7, %p2008_p13 }
 0x781   : > { %p2011_p5 = pnand %p2010_p3, %p2004_p9 }
 0x7f1   : > { %v1263_v57 = vpop.xlane.xlu0 %1262 }
 0x7f2   : > { %1825 = vrcp.f32 %v1263_v57 }
 0x7f5   : > { %v1268_v58 = vpop.permute.xlu0 %1267 }
 0x7f6   : > { %v1273_v59 = vsel %vm794_vm3, %v1268_v58, 0 }
 0x7f7   : > { %1687 = vmatpush3.bf16.msra.mxu1 %v1273_v59 }
 0x7f8   : > { %1692 = vmatprep.subr.bf16.mxu1 %v2089_v0 }
 0x7fc   : > { %v1826_v60 = vpop.eup %1825 }
 0x7fd   : > { %v1265_v62 = vmul.f32 %v1826_v60, %v1824_v55 }
 0x7ff   : > { %v1266_v63 = vpack.c.bf16 %v1265_v62, %v1265_v62 }
 0x801   : > { %1689 = vmatmul.mubr.msk.bf16.vlgmr.msra.gmra.mrb[16].mxu1 %vm732_vm2, %v1266_v63 }
 0x802   : > { %1693 = vmatpush3.bf16.msra.mxu1 %v1320_v1  ;;  %1694 = vmatprep.mubr.msk.bf16.mxu1 %vm2090_vm0, %v2089_v0 }
 0x8d4   : > { %v1309_v41 = vpop.f32.mrb[16].mxu1 }
 0x8d5   : > { %v1315_v2 = vpack.c.bf16 %v1309_v41, %v1309_v41  ;;  %v1690_v3 = vpop.f32.mrb[17].mxu1 }
 0x8d6   : > { %v1312_v4 = vpop.f32.mrb[18].mxu1 }
 0x8d7   : > { %v1691_v5 = vpop.f32.mrb[19].mxu1  ;;  %1695 = vmatmul.mubr.msk.bf16.vlgmr.msra.gmra.mrb[8].mxu1 %vm732_vm2, %v1315_v2 }
 0x9aa   : > { %v1356_v7 = vpop.f32.mrb[8].mxu1 }
 0x9ab   : > { %v1698_v8 = vadd.f32 %v1552_v6, %v1356_v7  ;;  %v1696_v0 = vpop.f32.mrb[9].mxu1 }
 0x9ac   : > { %v1359_v9 = vpop.f32.mrb[10].mxu1 }
 0x9ad   : > { %v1697_v10 = vpop.f32.mrb[11].mxu1  ;;  %1363 = vst.msk [vmem:[%s514_s20] sm:$0xff] %vm557_vm1, %v1698_v8 }
 0x9ae   : > { %2014 = shalt.err (!%p2011_p5)
}
 0x9af   : > { %s2015_s16 = scalar_lea.hbm %s2584_s3, 128  ;;  %s2019_s27 = scalar_lea.hbm %s2706_s11, 256 }
 0x9b0   : > { %p2016_p2 = scmp.ne.s32.totalorder %s2584_s3, %s2015_s16  ;;  %p2020_p12 = scmp.lt.u32.totalorder %s2584_s3, %s2706_s11 }
 0x9b1   : > { %p2021_p1 = scmp.lt.u32.totalorder %s2019_s27, %s2015_s16  ;;  %p2023_p10 = scmp.lt.u32.totalorder %s2015_s16, %s2584_s3 }
 0x9b2   : > { %p2017_p8 = pnand %p2016_p2, %p2707_p0 }
 0x9b3   : > { %p2022_p6 = por %p2021_p1, %p2020_p12 }
 0x9b4   : > { %p2018_p11 = pneg %p2017_p8 }
 0x9b5   : > { %p2024_p4 = por %p2023_p10, %p2022_p6 }
 0x9b7   : > { %p2025_p9 = pnand %p2024_p4, %p2018_p11 }
 0x9b9   : > { %2028 = shalt.err (!%p2025_p9)
}
 0x9ba   : > { %1729 = dma.vmem_to_hbm [thread:$0]  (%p2707_p0), %s2586_s10, 128, %s2584_s3, %s1365_s21  }
 0x9bb PF: > { %s2708_s12 = sld [smem:[#allocation19_spill]]  ;;  %s2709_s24 = sld [smem:[#allocation21_spill]] }
 0x9bc   : > { %s2710_s22 = sld [smem:[#allocation20_spill]] }
 0x9c1   : > { %s1390_s4 = sand.u32 1, %s2708_s12   ;;  %p2711_p13 = scmp.ne.s32.totalorder %s2709_s24, 0 }
 0x9c2   : > { %p2712_p7 = scmp.ge.s32.totalorder %s2710_s22, 2  ;;  %s1391_s20 = scalar_lea.sflag [#allocation4], %s1390_s4 }
 0x9c4   : > { %p1752_p3 = pnand %p2712_p7, %p2711_p13 }
 0x9c6   : > { %2062 = dma.done.wait (!%p1752_p3), %s1391_s20, 128  }
 0x9c7   : > { %2064 = vsyncadd (!%p1752_p3), %s1391_s20, 4294967168  ;;  %s2713_s20 = sld [smem:[#allocation22_spill]]  ;;  %s2714_s15 = sld [smem:[#allocation23_spill]] }
 0x9c8   : > { %s2715_s17 = smov %s2071_s18  ;;  %s2716_s18 = smov %s2075_s19 }
 0x9cd   : > { %p29_p5 = scmp.ge.s32.totalorder %s2713_s20, 4   ;;  %s2717_s19 = smov %s2714_s15 }
 0x9cf   :  { %31 = sbr.rel (!%p29_p5) target bundleno = 16 (0x10), region = 145 }
 0x9d6   :  { %1396 = vsyncpa [#allocation3], 1 }
 0x9d7   :  { %1398 = vsyncpa [#allocation3 + $0x1], 1 }
 0x9d8   :  { %1399 = vsyncpa [#allocation6], 1 }
 0x9d9   :  { %1401 = vsyncpa [#allocation6 + $0x1], 1 }
 0x9da   :  { %1402 = vsyncpa [#allocation9], 1 }
 0x9db   :  { %1403 = vsyncpa [#allocation12], 1 }
 0x9dc   :  { %1404 = vsyncpa [#allocation4], 1 }
 0x9dd   :  { %1406 = vsyncpa [#allocation4 + $0x1], 1 }

</bundles_post_ra>
